<compile_context>
chip_gen: v5e
topology: v5e:2x2
jax: 0.10.0
libtpu: 0.0.40
codegen_flags: <defaults>
</compile_context>

<pallas_src>
import math

import jax
import jax.numpy as jnp
from jax.experimental import pallas as pl
from jax.experimental.pallas import tpu as pltpu


def _identity_kernel(x_ref, o_ref):
    # Whole-tile copy: load the VMEM block and store it back unchanged.
    o_ref[...] = x_ref[...]


def _choose_2d_view(total: int):
    """Pick a lane-dense (rows, lanes) factorization with lanes % 128 == 0."""
    fallback = None
    for lanes in (4096, 2048, 1024, 512, 256, 128):
        if total % lanes == 0:
            rows = total // lanes
            if rows >= 8:          # prefer full sublane tiles
                return rows, lanes
            if fallback is None:
                fallback = (rows, lanes)
    return fallback


def _pick_tile_rows(rows: int, sublane: int, lane_bytes: int) -> int:
    """Largest tile_r (sublane multiple, <= ~4 MiB) that divides rows exactly,
    preferring an even grid length so v7x's two TensorCores stay balanced."""
    target_tile_bytes = 4 << 20                     # ~4 MiB per input tile
    max_rows = max(sublane,
                   (target_tile_bytes // lane_bytes) // sublane * sublane)

    if rows <= max_rows:
        # Whole array fits in one tile.  If it's big enough to be worth
        # splitting, halve it so both v7x TCs get one (even) grid step.
        half = rows // 2
        if (rows * lane_bytes >= (2 << 20)
                and rows % (2 * sublane) == 0
                and half >= sublane):
            return half
        return rows

    best_even = 0      # tile_r giving an even grid length
    best_any = 0       # tile_r giving an exact (non-ragged) grid
    t = sublane
    while t <= max_rows:
        if rows % t == 0:
            n = rows // t
            if n % 2 == 0 and t > best_even:
                best_even = t
            if t > best_any:
                best_any = t
        t += sublane
    if best_even:
        return best_even
    if best_any:
        return best_any
    return max_rows    # no exact divisor: accept one ragged final block


def _pallas_identity_copy_impl(x: jax.Array) -> jax.Array:
    orig_shape = x.shape
    dtype = x.dtype
    total = math.prod(orig_shape) if orig_shape else 1
    if total == 0:
        return x

    view = _choose_2d_view(total)
    if view is None:
        # TODO(synk): element count not a multiple of 128 -> no lane-dense
        # view; identity has no compute, so pass the array through unchanged.
        return x

    rows, lanes = view
    x2 = x.reshape(rows, lanes)

    itemsize = jnp.dtype(dtype).itemsize
    sublane = max(8, 32 // itemsize)          # 8 (f32) / 16 (bf16) / 32 (int8)
    tile_r = _pick_tile_rows(rows, sublane, lanes * itemsize)
    grid = (pl.cdiv(rows, tile_r),)

    out2 = pl.pallas_call(
        _identity_kernel,
        out_shape=jax.ShapeDtypeStruct((rows, lanes), dtype),
        grid_spec=pltpu.PrefetchScalarGridSpec(
            num_scalar_prefetch=0,
            grid=grid,
            in_specs=[pl.BlockSpec((tile_r, lanes), lambda i: (i, 0))],
            out_specs=pl.BlockSpec((tile_r, lanes), lambda i: (i, 0)),
        ),
        # With the jit-level donation below, this alias is real: the kernel
        # reads and writes the same HBM buffer (no defensive copy, no second
        # HBM allocation).
        input_output_aliases={0: 0},
        compiler_params=pltpu.CompilerParams(
            dimension_semantics=("parallel",),   # v7x: shard grid over 2 TCs
            vmem_limit_bytes=32 << 20,           # 4 MiB tiles fit on v5e too
        ),
    )(x2)

    return out2.reshape(orig_shape)


# Donate the argument so the input_output_aliases takes effect (halves HBM
# traffic vs. the previous defensive-copy behaviour).  Callers must not reuse
# the array they pass in.
_pallas_identity_copy = jax.jit(_pallas_identity_copy_impl, donate_argnums=0)


def empty_layer(x: jax.Array, *, force_copy: bool = False) -> jax.Array:
    """EmptyLayer.forward: identity.

    Default (force_copy=False): return x directly — zero bytes moved, the
    correct "optimization" for a passthrough layer.
    force_copy=True: run the Pallas copy kernel (demo path; DONATES x).
    """
    if not force_copy:
        return x
    return _pallas_identity_copy(x)


if __name__ == "__main__":
    def make(seed: int, shape):
        return jax.random.normal(jax.random.PRNGKey(seed), shape,
                                 dtype=jnp.float32)

    shape_small = (2, 4, 16, 16)     # Darknet-style NCHW feature map
    shape_big = (8, 64, 64, 64)      # exercises 4 MiB tiles, even 2-step grid

    # 1) Default path: true identity, no kernel launched.
    x = make(0, shape_small)
    y0 = empty_layer(x)
    jax.block_until_ready(y0)
    assert y0.shape == x.shape and y0.dtype == x.dtype
    assert bool(jnp.array_equal(y0, x)), "identity (passthrough) mismatch"

    # 2) Pallas copy path on the small input (grid of 1, lane-dense tile).
    #    The input is donated, so compare against regenerated reference data.
    x1 = make(0, shape_small)
    y1 = empty_layer(x1, force_copy=True)      # x1 is donated; do not reuse
    jax.block_until_ready(y1)
    ref1 = make(0, shape_small)
    assert y1.shape == ref1.shape and y1.dtype == ref1.dtype
    assert bool(jnp.array_equal(y1, ref1)), "identity kernel mismatch (small)"

    # 3) Larger input: 4 MiB tiles, even grid of 2 (dual-TC friendly on v7x).
    x2 = make(1, shape_big)
    y2 = empty_layer(x2, force_copy=True)      # x2 is donated; do not reuse
    jax.block_until_ready(y2)
    ref2 = make(1, shape_big)
    assert y2.shape == ref2.shape and y2.dtype == ref2.dtype
    assert bool(jnp.array_equal(y2, ref2)), "identity kernel mismatch (large)"

    print("KERNEL_OK")
</pallas_src>

<mosaic_0001>
module attributes {stable_mosaic.version = 11 : i64} {
  func.func @_identity_kernel(%arg0: i32, %arg1: memref<8x256xf32, #tpu.memory_space<vmem>>, %arg2: memref<8x256xf32, #tpu.memory_space<vmem>>) attributes {dimension_semantics = [#tpu.dimension_semantics<parallel>], iteration_bounds = array<i64: 1>, scalar_prefetch = 0 : i64, scratch_operands = 0 : i64, tpu.core_type = #tpu.core_type<tc>, window_params = [{transform_indices = @transform_0, window_bounds = array<i64: 8, 256>}, {transform_indices = @transform_1, window_bounds = array<i64: 8, 256>}]} {
    %c0 = arith.constant 0 : index
    %c0_0 = arith.constant 0 : index
    %0 = vector.load %arg1[%c0, %c0_0] : memref<8x256xf32, #tpu.memory_space<vmem>>, vector<8x256xf32>
    %c0_1 = arith.constant 0 : index
    %c0_2 = arith.constant 0 : index
    %1 = vector.load %arg2[%c0_1, %c0_2] : memref<8x256xf32, #tpu.memory_space<vmem>>, vector<8x256xf32>
    tpu.vector_store %arg2[%c0_1, %c0_2], %0 {strides = array<i32>} : memref<8x256xf32, #tpu.memory_space<vmem>>, vector<8x256xf32>,
    return
  }
  func.func @transform_0(%arg0: i32) -> (i32, i32) {
    %c0_i32 = arith.constant 0 : i32
    %c0_i32_0 = arith.constant 0 : i32
    return %arg0, %c0_i32 : i32, i32
  }
  func.func @transform_1(%arg0: i32) -> (i32, i32) {
    %c0_i32 = arith.constant 0 : i32
    %c0_i32_0 = arith.constant 0 : i32
    return %arg0, %c0_i32 : i32, i32
  }
}

</mosaic_0001>

<bundles_post_ra>
// kernel: _pallas_identity_copy_impl.1
= control target key start
LH: loop header
LB: loop body
LE: loop exit
PB: predicated region body
PF: predicated region fallthrough
CT: control target
= control target key end

     0   :  { %s38_s0 = inlined_call_operand.vmem [shape: f32[8,256], index: 0, kind: input, shape index: {}, may-alias: {0,1}]   ;;  %s39_s1 = inlined_call_operand.vmem [shape: f32[8,256], index: 1, kind: output, shape index: {}, may-alias: {0,1}]  }
   0x1   :  { %v8_v0 = vld [vmem:[%s38_s0] sm:$0xff]  ;;  %v9_v1 = vld [vmem:[%s38_s0 + $0x8] sm:$0xff] }
   0x2   :  { %10 = vst [vmem:[%s39_s1] sm:$0xff] %v8_v0 }
   0x3   :  { %11 = vst [vmem:[%s39_s1 + $0x8] sm:$0xff] %v9_v1 }

</bundles_post_ra>
